<compile_context>
chip_gen: v6e
topology: v6e:2x2x1
jax: 0.10.0
libtpu: 0.0.40
codegen_flags: <defaults>
</compile_context>

<pallas_src>
import functools

import jax
import jax.numpy as jnp
from jax import lax
from jax.experimental import pallas as pl
from jax.experimental.pallas import tpu as pltpu


def _round_up(a, b):
    return (a + b - 1) // b * b


def _cdiv(a, b):
    return (a + b - 1) // b


def _patch_merge_kernel(p_ref, w_ref, prm_ref, o_ref, *, eps, inv_c):
    # p_ref:   (tm, kk)            im2col patch tile (bf16), K unpadded in HBM
    # w_ref:   (kk, c_out_pad)     conv weight, HWIO-flattened, C_out zero-padded
    # prm_ref: (8, c_out_pad)      row0=bias row1=gamma row2=beta row3=channel mask
    # o_ref:   (tm, c_out_pad)     lane-dense output tile
    acc = jnp.dot(p_ref[...], w_ref[...], preferred_element_type=jnp.float32)
    bias = prm_ref[0:1, :]
    gamma = prm_ref[1:2, :]
    beta = prm_ref[2:3, :]
    mask = prm_ref[3:4, :]                         # 1.0 on real channels, 0.0 on padding

    acc = (acc + bias) * mask                      # padded lanes forced to exactly 0
    # Single-pass LayerNorm statistics over the real channels only.
    mean = jnp.sum(acc, axis=-1, keepdims=True) * inv_c
    ex2 = jnp.sum(acc * acc, axis=-1, keepdims=True) * inv_c
    var = jnp.maximum(ex2 - mean * mean, 0.0)
    normed = (acc - mean) * lax.rsqrt(var + eps)   # rsqrt -> EUP slot, off the VPU path
    o_ref[...] = (normed * gamma + beta).astype(o_ref.dtype)


def _choose_row_tiling(m, kk, c_out_pad, out_itemsize, budget_bytes, tm_cap=2048):
    """Pick a 16-aligned row tile so the double-buffered per-step working set fits
    `budget_bytes`, while keeping >= 2 grid steps when possible (v7x has 2 TCs)."""
    m16 = _round_up(m, 16)
    per_row = 2 * kk * 2 + 2 * c_out_pad * out_itemsize   # bf16 patches + out, x2 buffers
    tm = max(16, min(tm_cap, budget_bytes // max(per_row, 1)))
    tm = (tm // 16) * 16
    tm = min(tm, m16)
    min_steps = 2 if m16 >= 32 else 1
    steps = max(min_steps, _cdiv(m16, tm))
    tm = _round_up(_cdiv(m16, steps), 16)
    steps = _cdiv(m16, tm)
    return tm, steps


def overlap_patch_merging_nhwc(x_nhwc, weight, bias, gamma, beta, *, stride,
                               eps=1e-5, compute_dtype=jnp.bfloat16,
                               out_dtype=None, vmem_budget_bytes=12 << 20):
    """Core (fast) path.  x_nhwc: (N, H, W, C_in).  weight: (C_out, C_in, k, k) (OIHW).
    Returns (N, H_out, W_out, C_out)."""
    n, h, w, c_in = x_nhwc.shape
    c_out, _, k, _ = weight.shape
    pad = k // 2
    h_out = (h + 2 * pad - k) // stride + 1
    w_out = (w + 2 * pad - k) // stride + 1
    out_dtype = x_nhwc.dtype if out_dtype is None else out_dtype

    m = n * h_out * w_out
    kk = c_in * k * k
    c_out_pad = _round_up(c_out, 128)
    out_itemsize = jnp.dtype(out_dtype).itemsize

    tm, steps = _choose_row_tiling(m, kk, c_out_pad, out_itemsize, vmem_budget_bytes)
    m_pad = tm * steps

    # ---- glue: cast once to bf16, pad, build im2col patches in (kh, kw, c) order ----
    xp = jnp.pad(x_nhwc.astype(compute_dtype),
                 ((0, 0), (pad, pad), (pad, pad), (0, 0)))
    cols = [
        xp[:, kh:kh + stride * h_out:stride, kw:kw + stride * w_out:stride, :]
        for kh in range(k) for kw in range(k)
    ]
    patches = jnp.concatenate(cols, axis=-1).reshape(m, kk)   # (M, k*k*C_in)
    patches = jnp.pad(patches, ((0, m_pad - m), (0, 0)))       # rows only; K stays unpadded

    # Conv weight -> (k, k, C_in, C_out) -> (kk, C_out_pad), matching the patch order.
    w_mat = weight.transpose(2, 3, 1, 0).reshape(kk, c_out)
    w_mat = jnp.pad(w_mat, ((0, 0), (0, c_out_pad - c_out))).astype(compute_dtype)

    # Merged per-channel params (f32): bias / gamma / beta / channel-validity mask.
    prm = jnp.zeros((8, c_out_pad), jnp.float32)
    prm = prm.at[0, :c_out].set(bias.astype(jnp.float32))
    prm = prm.at[1, :c_out].set(gamma.astype(jnp.float32))
    prm = prm.at[2, :c_out].set(beta.astype(jnp.float32))
    prm = prm.at[3, :c_out].set(1.0)

    # Explicit scoped-VMEM limit from the estimated working set (generation-safe:
    # floor 32 MiB, cap 56 MiB < v7x's 64 MiB physical per TensorCore).
    est = (2 * tm * kk * 2 + 2 * tm * c_out_pad * out_itemsize
           + 2 * kk * c_out_pad * 2 + 2 * 8 * c_out_pad * 4)
    vmem_limit = int(min(56 << 20, max(32 << 20, 2 * est)))

    kernel = functools.partial(_patch_merge_kernel, eps=float(eps),
                               inv_c=1.0 / float(c_out))

    out_rows = pl.pallas_call(
        kernel,
        out_shape=jax.ShapeDtypeStruct((m_pad, c_out_pad), out_dtype),
        grid_spec=pltpu.PrefetchScalarGridSpec(
            num_scalar_prefetch=0,
            grid=(steps,),
            in_specs=[
                pl.BlockSpec((tm, kk), lambda i: (i, 0)),           # patches (K unpadded)
                pl.BlockSpec((kk, c_out_pad), lambda i: (0, 0)),    # weight, revisited
                pl.BlockSpec((8, c_out_pad), lambda i: (0, 0)),     # params, revisited
            ],
            out_specs=pl.BlockSpec((tm, c_out_pad), lambda i: (i, 0)),
        ),
        compiler_params=pltpu.CompilerParams(
            dimension_semantics=("parallel",),
            vmem_limit_bytes=vmem_limit,
        ),
    )(patches, w_mat, prm)

    # Drop row / channel padding; reshape to NHWC (slice fuses into the consumer copy).
    return out_rows[:m, :c_out].reshape(n, h_out, w_out, c_out)


def overlap_patch_merging(x, weight, bias, gamma, beta, *, stride, eps=1e-5,
                          compute_dtype=jnp.bfloat16, out_dtype=None):
    """PyTorch-compatible wrapper: x (N, C_in, H, W) NCHW -> (N, C_out, H_out, W_out)."""
    y = overlap_patch_merging_nhwc(jnp.transpose(x, (0, 2, 3, 1)), weight, bias, gamma,
                                   beta, stride=stride, eps=eps,
                                   compute_dtype=compute_dtype, out_dtype=out_dtype)
    return jnp.transpose(y, (0, 3, 1, 2))


def _reference(x, weight, bias, gamma, beta, *, stride, eps=1e-5,
               compute_dtype=jnp.float32):
    """Plain-JAX reference: conv2d (NCHW) + LayerNorm over channels, with the same
    optional operand-dtype cast as the kernel (f32 accumulation either way)."""
    k = weight.shape[-1]
    pad = k // 2
    y = lax.conv_general_dilated(
        x.astype(compute_dtype), weight.astype(compute_dtype),
        window_strides=(stride, stride),
        padding=[(pad, pad), (pad, pad)],
        dimension_numbers=("NCHW", "OIHW", "NCHW"),
        preferred_element_type=jnp.float32,
    ) + bias[None, :, None, None]
    mean = jnp.mean(y, axis=1, keepdims=True)
    var = jnp.mean((y - mean) ** 2, axis=1, keepdims=True)
    yn = (y - mean) * lax.rsqrt(var + eps)
    return yn * gamma[None, :, None, None] + beta[None, :, None, None]


if __name__ == "__main__":
    # Small, deterministic config: in_channels=4, out_channels=32,
    # kernel_size=3, stride=2 -> 16x16 spatial becomes 8x8.
    key = jax.random.PRNGKey(0)
    kx, kw_, kb = jax.random.split(key, 3)

    N, C_in, H, W = 2, 4, 16, 16
    C_out, K, STRIDE = 32, 3, 2

    x = jax.random.normal(kx, (N, C_in, H, W), dtype=jnp.float32)
    weight = jax.random.normal(kw_, (C_out, C_in, K, K), dtype=jnp.float32) * 0.1
    bias = jax.random.normal(kb, (C_out,), dtype=jnp.float32) * 0.1
    gamma = jnp.ones((C_out,), dtype=jnp.float32)
    beta = jnp.zeros((C_out,), dtype=jnp.float32)

    out = overlap_patch_merging(x, weight, bias, gamma, beta, stride=STRIDE)
    out = jax.block_until_ready(out)
    assert out.shape == (N, C_out, H // STRIDE, W // STRIDE), out.shape

    # Primary check: reference using the same bf16 operand cast (f32 accumulation).
    ref_bf16 = _reference(x, weight, bias, gamma, beta, stride=STRIDE,
                          compute_dtype=jnp.bfloat16)
    err = float(jnp.max(jnp.abs(out - ref_bf16)))
    assert jnp.allclose(out, ref_bf16, atol=1e-3, rtol=1e-3), err

    # Secondary sanity check against the full-f32 reference (loose: bf16 MXU inputs).
    ref_f32 = _reference(x, weight, bias, gamma, beta, stride=STRIDE,
                         compute_dtype=jnp.float32)
    err32 = float(jnp.max(jnp.abs(out - ref_f32)))
    assert jnp.allclose(out, ref_f32, atol=1e-1, rtol=1e-1), err32

    print("KERNEL_OK")
</pallas_src>

<mosaic_0001>
module attributes {stable_mosaic.version = 11 : i64} {
  func.func @_patch_merge_kernel(%arg0: i32, %arg1: memref<64x36xbf16, #tpu.memory_space<vmem>>, %arg2: memref<36x128xbf16, #tpu.memory_space<vmem>>, %arg3: memref<8x128xf32, #tpu.memory_space<vmem>>, %arg4: memref<64x128xf32, #tpu.memory_space<vmem>>) attributes {dimension_semantics = [#tpu.dimension_semantics<parallel>], iteration_bounds = array<i64: 2>, scalar_prefetch = 0 : i64, scratch_operands = 0 : i64, tpu.core_type = #tpu.core_type<tc>, window_params = [{transform_indices = @transform_0, window_bounds = array<i64: 64, 36>}, {pipeline_mode = #tpu.pipeline_mode<synchronous>, transform_indices = @transform_1, window_bounds = array<i64: 36, 128>}, {pipeline_mode = #tpu.pipeline_mode<synchronous>, transform_indices = @transform_2, window_bounds = array<i64: 8, 128>}, {transform_indices = @transform_3, window_bounds = array<i64: 64, 128>}]} {
    %c0 = arith.constant 0 : index
    %c0_0 = arith.constant 0 : index
    %0 = vector.load %arg1[%c0, %c0_0] : memref<64x36xbf16, #tpu.memory_space<vmem>>, vector<64x36xbf16>
    %c0_1 = arith.constant 0 : index
    %c0_2 = arith.constant 0 : index
    %1 = vector.load %arg2[%c0_1, %c0_2] : memref<36x128xbf16, #tpu.memory_space<vmem>>, vector<36x128xbf16>
    %cst = arith.constant dense<0.000000e+00> : vector<64x128xf32>
    %2 = tpu.matmul %0, %1, %cst {dimension_numbers = #tpu.dot_dimension_numbers<[1], [0], [0], [1], [0, 0, 1, 1], [], []>} : vector<64x36xbf16>, vector<36x128xbf16>, vector<64x128xf32> -> vector<64x128xf32>
    %c0_3 = arith.constant 0 : index
    %c0_4 = arith.constant 0 : index
    %3 = vector.load %arg3[%c0_3, %c0_4] : memref<8x128xf32, #tpu.memory_space<vmem>>, vector<1x128xf32>
    %c1 = arith.constant 1 : index
    %c0_5 = arith.constant 0 : index
    %4 = vector.load %arg3[%c1, %c0_5] : memref<8x128xf32, #tpu.memory_space<vmem>>, vector<1x128xf32>
    %c2 = arith.constant 2 : index
    %c0_6 = arith.constant 0 : index
    %5 = vector.load %arg3[%c2, %c0_6] : memref<8x128xf32, #tpu.memory_space<vmem>>, vector<1x128xf32>
    %c3 = arith.constant 3 : index
    %c0_7 = arith.constant 0 : index
    %6 = vector.load %arg3[%c3, %c0_7] : memref<8x128xf32, #tpu.memory_space<vmem>>, vector<1x128xf32>
    %7 = vector.broadcast %3 : vector<1x128xf32> to vector<64x128xf32>
    %8 = arith.addf %2, %7 : vector<64x128xf32>
    %9 = vector.broadcast %6 : vector<1x128xf32> to vector<64x128xf32>
    %10 = arith.mulf %8, %9 : vector<64x128xf32>
    %cst_8 = arith.constant dense<0.000000e+00> : vector<64xf32>
    %11 = vector.multi_reduction <add>, %10, %cst_8 [1] : vector<64x128xf32> to vector<64xf32>
    %12 = vector.shape_cast %11 : vector<64xf32> to vector<64x1xf32>
    %cst_9 = arith.constant 3.125000e-02 : f32
    %13 = vector.broadcast %cst_9 : f32 to vector<64x1xf32>
    %14 = arith.mulf %12, %13 : vector<64x1xf32>
    %15 = arith.mulf %10, %10 : vector<64x128xf32>
    %cst_10 = arith.constant dense<0.000000e+00> : vector<64xf32>
    %16 = vector.multi_reduction <add>, %15, %cst_10 [1] : vector<64x128xf32> to vector<64xf32>
    %17 = vector.shape_cast %16 : vector<64xf32> to vector<64x1xf32>
    %cst_11 = arith.constant 3.125000e-02 : f32
    %18 = vector.broadcast %cst_11 : f32 to vector<64x1xf32>
    %19 = arith.mulf %17, %18 : vector<64x1xf32>
    %20 = arith.mulf %14, %14 : vector<64x1xf32>
    %21 = arith.subf %19, %20 : vector<64x1xf32>
    %cst_12 = arith.constant 0.000000e+00 : f32
    %22 = vector.broadcast %cst_12 : f32 to vector<64x1xf32>
    %23 = arith.maximumf %21, %22 : vector<64x1xf32>
    %24 = vector.broadcast %14 : vector<64x1xf32> to vector<64x128xf32>
    %25 = arith.subf %10, %24 : vector<64x128xf32>
    %cst_13 = arith.constant 9.99999974E-6 : f32
    %26 = vector.broadcast %cst_13 : f32 to vector<64x1xf32>
    %27 = arith.addf %23, %26 : vector<64x1xf32>
    %28 = math.rsqrt %27 : vector<64x1xf32>
    %29 = vector.broadcast %28 : vector<64x1xf32> to vector<64x128xf32>
    %30 = arith.mulf %25, %29 : vector<64x128xf32>
    %31 = vector.broadcast %4 : vector<1x128xf32> to vector<64x128xf32>
    %32 = arith.mulf %30, %31 : vector<64x128xf32>
    %33 = vector.broadcast %5 : vector<1x128xf32> to vector<64x128xf32>
    %34 = arith.addf %32, %33 : vector<64x128xf32>
    %c0_14 = arith.constant 0 : index
    %c0_15 = arith.constant 0 : index
    %35 = vector.load %arg4[%c0_14, %c0_15] : memref<64x128xf32, #tpu.memory_space<vmem>>, vector<64x128xf32>
    tpu.vector_store %arg4[%c0_14, %c0_15], %34 {strides = array<i32>} : memref<64x128xf32, #tpu.memory_space<vmem>>, vector<64x128xf32>,
    return
  }
  func.func @transform_0(%arg0: i32) -> (i32, i32) {
    %c0_i32 = arith.constant 0 : i32
    %c0_i32_0 = arith.constant 0 : i32
    return %arg0, %c0_i32 : i32, i32
  }
  func.func @transform_1(%arg0: i32) -> (i32, i32) {
    %c0_i32 = arith.constant 0 : i32
    %c0_i32_0 = arith.constant 0 : i32
    %c0_i32_1 = arith.constant 0 : i32
    return %c0_i32, %c0_i32_0 : i32, i32
  }
  func.func @transform_2(%arg0: i32) -> (i32, i32) {
    %c0_i32 = arith.constant 0 : i32
    %c0_i32_0 = arith.constant 0 : i32
    %c0_i32_1 = arith.constant 0 : i32
    return %c0_i32, %c0_i32_0 : i32, i32
  }
  func.func @transform_3(%arg0: i32) -> (i32, i32) {
    %c0_i32 = arith.constant 0 : i32
    %c0_i32_0 = arith.constant 0 : i32
    return %arg0, %c0_i32 : i32, i32
  }
}

</mosaic_0001>

<bundles_post_ra>
// kernel: tpu_custom_call.1
= control target key start
LH: loop header
LB: loop body
LE: loop exit
PB: predicated region body
PF: predicated region fallthrough
CT: control target
= control target key end

     0   :  { %8 = vsyncpa [#allocation3], 0  ;;  %s974_s0 = inlined_call_operand.vmem [shape: bf16[128,36], index: 0, kind: input, shape index: {}]   ;;  %s975_s1 = inlined_call_operand.vmem [shape: bf16[36,128], index: 1, kind: input, shape index: {}]   ;;  %s976_s2 = inlined_call_operand.vmem [shape: f32[8,128], index: 2, kind: input, shape index: {}]   ;;  %s977_s3 = inlined_call_operand.hbm [shape: f32[128,128], index: 3, kind: output, shape index: {}]  }
   0x1   :  { %10 = vsyncpa [#allocation3 + $0x1], 0  ;;  %s749_s12 = smov 0   ;;  %s751_s13 = smov 0  }
   0x2   :  { %s753_s14 = smov 0   ;;  %s755_s15 = smov 0  }
   0x3 LB: > { %s770_s16 = sadd.s32 4294967295, %s724_s15   ;;  %s543_s17 = sadd.s32 4294967294, %s724_s15   ;;  %s724_s15 = sphi %s755_s15, %s983_s15   ;;  %s720_s14 = sphi %s753_s14, %s982_s14   ;;  %s716_s13 = sphi %s751_s13, %s981_s13   ;;  %s712_s12 = sphi %s749_s12, %s980_s12  }
   0x4   : > { %s774_s18 = sadd.s32 1, %s724_s15   ;;  %s91_s19 = sadd.s32 1, %s720_s14 }
   0x5   : > { %s88_s20 = ssub.s32 %s724_s15, %s774_s18  ;;  %p101_p0 = scmp.ne.s32.totalorder %s720_s14, %s716_s13 }
   0x6   : > { %p89_p1 = scmp.eq.s32.totalorder %s88_s20, 0  ;;  %p102_p2 = scmp.eq.s32.totalorder %s770_s16, 1 }
   0x7   : > { %p107_p3 = scmp.ne.s32.totalorder %s716_s13, %s712_s12  ;;  %p108_p4 = scmp.eq.s32.totalorder %s543_s17, 1 }
   0x8   : > { %s785_s21 = scalar_select %p89_p1, %s720_s14, %s91_s19  }
   0x9   : > { %p787_p5 = por %p102_p2, %p101_p0  ;;  %p791_p6 = por %p108_p4, %p107_p3 }
   0xa   : > { %p546_p7 = scmp.ge.s32.totalorder %s724_s15, 1  ;;  %p141_p8 = scmp.lt.s32.totalorder %s724_s15, 3 }
   0xc   : > { %p142_p9 = pnand %p546_p7, %p141_p8 }
   0xd   : > { %s548_s28 = sshll.u32 (!%p142_p9), %s770_s16, 3  ;;  %s162_s17 = sand.u32 (!%p142_p9), 1, %s716_s13  }
   0xe   : > { %145 = sbr.rel (%p142_p9) target bundleno = 438 (0x1b6), region = 32  ;;  %p166_p10 = scmp.lt.s32.totalorder (!%p142_p9), %s548_s28, 15 }
   0xf   : > { %s547_s24 = sshll.u32 (!%p142_p9), %s162_s17, 6 }
  0x10   : > { %s905_s27 = scalar_lea.vmem (!%p142_p9), [#allocation2], %s547_s24 }
  0x11   : > { %s481_s29 = sshll.u32 (!%p142_p9), %s905_s27, 4  ;;  %s928_s29 = int_to_ptr.vmem [resolvable:$true] %s481_s29 }
  0x12   : > { %s664_s6 = scalar_lea.vmem (!%p142_p9), %s928_s29, 1024 }
  0x13   : > { %v641_v0 = vld [vmem:[%s975_s1 + $0x10] ss:$0 sps:$4 sm:$0x33]   ;;  %vm242_vm0 = vcmask 1041408   ;;  %v642_v1 = vld [vmem:[%s975_s1 + $0x8] sm:$0xff]   ;;  %v643_v3 = vld [vmem:[%s975_s1] sm:$0xff]   ;;  %p665_p11 = scmp.ne.s32.totalorder %s928_s29, %s664_s6 }
  0x14   : > { %598 = vmatprep.subr.msk.bf16.mxu0 %vm242_vm0, %v641_v0  ;;  %599 = vmatprep.subr.msk.bf16.mxu1 %vm242_vm0, %v641_v0  ;;  %v244_v2 = vsel %vm242_vm0, %v641_v0, 0  ;;  %s985_s28 = smov (!%p166_p10, %s548_s28), 15  ;;  %vm229_vm1 = vcmask 293888   ;;  %v550_v8 = vld [vmem:[%s976_s2] ss:$0 sm:$0xff] }
  0x15   : > { %579 = vmatpush3.bf16.msra.mxu0 %v244_v2  ;;  %595 = vmatpush3.bf16.msra.mxu1 %v244_v2  ;;  %s549_s4 = sshll.u32 %s985_s28, 2  ;;  %v562_v9 = vld [vmem:[%s976_s2 + $0x3] ss:$0 sm:$0xff]  ;;  %s570_s28 = sshll.u32 %s770_s16, 10 }
  0x16   : > { %580 = vmatprep.subr.bf16.mxu0 %v642_v1  ;;  %593 = vmatprep.subr.bf16.mxu1 %v642_v1  ;;  %s169_s7 = scalar_lea.vmem %s974_s0, %s549_s4  ;;  %s926_s5 = scalar_lea.hbm %s977_s3, %s570_s28 }
  0x17   : > { %v644_v4 = vld [vmem:[%s169_s7] sm:$0xff]   ;;  %v645_v5 = vld [vmem:[%s169_s7 + $0x10] sm:$0xff]   ;;  %v646_v6 = vld [vmem:[%s169_s7 + $0x8] sm:$0xff]   ;;  %s934_s16 = scalar_lea.sflag [#allocation3], %s162_s17  ;;  %p666_p12 = pnand %p665_p11, %p787_p5 }
  0x18   : > { %584 = vmatprep.mubr.msk.bf16.mxu0 %vm229_vm1, %v644_v4  ;;  %588 = vmatprep.mubr.msk.bf16.mxu1 %vm229_vm1, %v645_v5  ;;  %v647_v7 = vld [vmem:[%s169_s7 + $0x18] sm:$0xff]   ;;  %s726_s7 = smov [#allocation2]  }
  0x19   : > { %581 = vmatpush3.bf16.msra.mxu0 %v642_v1  ;;  %596 = vmatpush3.bf16.msra.mxu1 %v642_v1  ;;  %p667_p13 = pneg %p666_p12  ;;  %s668_s8 = sshll.u32 %s726_s7, 4  ;;  %s669_s8 = int_to_ptr.vmem [resolvable:$false] %s668_s8 }
  0x1a   : > { %582 = vmatprep.subr.bf16.mxu0 %v643_v3  ;;  %594 = vmatprep.subr.bf16.mxu1 %v643_v3  ;;  %s670_s9 = scalar_lea.vmem %s669_s8, 2048  ;;  %p671_p0 = scmp.lt.s32.totalorder %s928_s29, %s669_s8 }
  0x1b   : > { %p672_p1 = scmp.lt.s32.totalorder %s670_s9, %s664_s6 }
  0x1d   : > { %583 = vmatpush3.bf16.msra.mxu0 %v643_v3  ;;  %597 = vmatpush3.bf16.msra.mxu1 %v643_v3  ;;  %p673_p2 = por %p672_p1, %p671_p0 }
  0x1f   : > { %p674_p3 = pnand %p673_p2, %p667_p13 }
  0x20   : > { %585 = vmatmul.mubr.msk.bf16.vlgmr.msra.gmra.mxu0 %vm229_vm1, %v646_v6  ;;  %589 = vmatmul.mubr.msk.bf16.vlgmr.msra.gmra.mxu1 %vm229_vm1, %v647_v7 }
  0xe0   : > { %v586_v10 = vpop.f32.mrf.mxu0  ;;  %v590_v11 = vpop.f32.mrf.mxu1 }
  0xe1   : > { %v289_v12 = vadd.f32 %v586_v10, %v550_v8  ;;  %v305_v13 = vadd.f32 %v590_v11, %v550_v8 }
  0xe2   : > { %v280_v14 = vpop.f32.mrf.mxu0  ;;  %v296_v15 = vpop.f32.mrf.mxu1 }
  0xe3   : > { %v816_v16 = vmul.f32 %v562_v9, %v289_v12  ;;  %v818_v17 = vmul.f32 %v562_v9, %v305_v13  ;;  %v281_v18 = vadd.f32 %v550_v8, %v280_v14  ;;  %v297_v23 = vadd.f32 %v550_v8, %v296_v15 }
  0xe4   : > { %v587_v19 = vpop.f32.mrf.mxu0  ;;  %v591_v21 = vpop.f32.mrf.mxu1 }
  0xe5   : > { %v292_v20 = vadd.f32 %v587_v19, %v550_v8  ;;  %335 = vadd.xlane.f32.xlu0 %v818_v17  ;;  %327 = vadd.xlane.f32.xlu1 %v816_v16  ;;  %v822_v22 = vmul.f32 %v562_v9, %v281_v18  ;;  %v308_v25 = vadd.f32 %v591_v21, %v550_v8 }
  0xe6   : > { %v299_v26 = vpop.f32.mrf.mxu1  ;;  %v828_v27 = vmul.f32 %v562_v9, %v297_v23  ;;  %v283_v30 = vpop.f32.mrf.mxu0  ;;  %v349_v31 = vmul.f32 %v816_v16, %v816_v16  ;;  %v353_v40 = vmul.f32 %v818_v17, %v818_v17 }
  0xe7   : > { %v824_v24 = vmul.f32 %v562_v9, %v292_v20  ;;  %v830_v28 = vmul.f32 %v562_v9, %v308_v25  ;;  %v300_v29 = vadd.f32 %v550_v8, %v299_v26  ;;  %v284_v32 = vadd.f32 %v550_v8, %v283_v30 }
  0xe8   : > { %v347_v34 = vmul.f32 %v822_v22, %v822_v22  ;;  %v351_v37 = vmul.f32 %v828_v27, %v828_v27 }
  0xe9   : > { %323 = vadd.xlane.f32.xlu0 %v822_v22  ;;  %329 = vadd.xlane.f32.xlu1 %v824_v24  ;;  %v836_v33 = vmul.f32 %v562_v9, %v300_v29  ;;  %v841_v35 = vmul.f32 %v562_v9, %v284_v32  ;;  %v350_v36 = vmul.f32 %v824_v24, %v824_v24 }
  0xea   : > { %v354_v41 = vmul.f32 %v830_v28, %v830_v28 }
  0xeb   : > { %v348_v38 = vmul.f32 %v841_v35, %v841_v35  ;;  %v352_v39 = vmul.f32 %v836_v33, %v836_v33 }
  0xed   : > { %331 = vadd.xlane.f32.xlu0 %v828_v27  ;;  %337 = vadd.xlane.f32.xlu1 %v830_v28 }
  0xf1   : > { %359 = vadd.xlane.f32.xlu0 %v349_v31  ;;  %333 = vadd.xlane.f32.xlu1 %v836_v33 }
  0xf5   : > { %355 = vadd.xlane.f32.xlu0 %v347_v34  ;;  %361 = vadd.xlane.f32.xlu1 %v350_v36 }
  0xf9   : > { %363 = vadd.xlane.f32.xlu0 %v351_v37  ;;  %357 = vadd.xlane.f32.xlu1 %v348_v38 }
  0xfd   : > { %325 = vadd.xlane.f32.xlu0 %v841_v35  ;;  %365 = vadd.xlane.f32.xlu1 %v352_v39 }
 0x101   : > { %367 = vadd.xlane.f32.xlu0 %v353_v40  ;;  %369 = vadd.xlane.f32.xlu1 %v354_v41 }
 0x16e   : > { %v336_v42 = vpop.xlane.xlu0 %335  ;;  %v328_v43 = vpop.xlane.xlu1 %327 }
 0x16f   : > { %v856_v47 = vmul.f32 0.03125, %v328_v43  ;;  %v874_v14 = vmul.f32 0.03125, %v336_v42 }
 0x171   : > { %v381_v50 = vmul.f32 %v856_v47, %v856_v47  ;;  %v385_v32 = vmul.f32 %v874_v14, %v874_v14 }
 0x172   : > { %v324_v44 = vpop.xlane.xlu0 %323  ;;  %v330_v45 = vpop.xlane.xlu1 %329 }
 0x173   : > { %v860_v51 = vmul.f32 0.03125, %v324_v44  ;;  %v862_v54 = vmul.f32 0.03125, %v330_v45  ;;  %v405_v45 = vsub.f32 %v816_v16, %v856_v47 }
 0x175   : > { %v379_v57 = vmul.f32 %v860_v51, %v860_v51  ;;  %v382_v62 = vmul.f32 %v862_v54, %v862_v54  ;;  %v403_v16 = vsub.f32 %v822_v22, %v860_v51 }
 0x176   : > { %v332_v46 = vpop.xlane.xlu0 %331  ;;  %v338_v48 = vpop.xlane.xlu1 %337 }
 0x177   : > { %v866_v58 = vmul.f32 0.03125, %v332_v46  ;;  %v878_v20 = vmul.f32 0.03125, %v338_v48 }
 0x179   : > { %v383_v4 = vmul.f32 %v866_v58, %v866_v58  ;;  %v386_v38 = vmul.f32 %v878_v20, %v878_v20 }
 0x17a   : > { %v360_v49 = vpop.xlane.xlu0 %359  ;;  %v334_v52 = vpop.xlane.xlu1 %333 }
 0x17b   : > { %v373_v53 = vmul.f32 0.03125, %v360_v49  ;;  %v872_v8 = vmul.f32 0.03125, %v334_v52 }
 0x17d   : > { %v389_v55 = vsub.f32 %v373_v53, %v381_v50  ;;  %v384_v21 = vmul.f32 %v872_v8, %v872_v8  ;;  %v563_v50 = vld [vmem:[%s976_s2 + $0x1] ss:$0 sm:$0xff] }
 0x17e   : > { %v356_v56 = vpop.xlane.xlu0 %355  ;;  %v362_v60 = vpop.xlane.xlu1 %361 }
 0x17f   : > { %v397_v59 = vmax.f32 %v389_v55, 0.0  ;;  %v371_v61 = vmul.f32 0.03125, %v356_v56  ;;  %v374_v63 = vmul.f32 0.03125, %v362_v60  ;;  %v564_v56 = vld [vmem:[%s976_s2 + $0x2] ss:$0 sm:$0xff]  ;;  %v406_v60 = vsub.f32 %v824_v24, %v862_v54 }
 0x181   : > { %v413_v0 = vadd.f32 1e-05, %v397_v59  ;;  %v387_v1 = vsub.f32 %v371_v61, %v379_v57  ;;  %v390_v2 = vsub.f32 %v374_v63, %v382_v62 }
 0x182   : > { %v364_v3 = vpop.xlane.xlu0 %363  ;;  %v358_v6 = vpop.xlane.xlu1 %357 }
 0x183   : > { %648 = vrsqrt.f32 %v413_v0  ;;  %v395_v5 = vmax.f32 %v387_v1, 0.0  ;;  %v375_v7 = vmul.f32 0.03125, %v364_v3  ;;  %v398_v9 = vmax.f32 %v390_v2, 0.0 }
 0x184   : > { %v372_v25 = vmul.f32 0.03125, %v358_v6  ;;  %v407_v1 = vsub.f32 %v828_v27, %v866_v58 }
 0x185   : > { %v411_v10 = vadd.f32 1e-05, %v395_v5  ;;  %v391_v11 = vsub.f32 %v375_v7, %v383_v4  ;;  %v414_v12 = vadd.f32 1e-05, %v398_v9  ;;  %v408_v5 = vsub.f32 %v836_v33, %v872_v8 }
 0x186   : > { %v326_v13 = vpop.xlane.xlu0 %325  ;;  %v366_v18 = vpop.xlane.xlu1 %365  ;;  %v410_v33 = vsub.f32 %v830_v28, %v878_v20 }
 0x187   : > { %650 = vrsqrt.f32 %v411_v10  ;;  %v399_v15 = vmax.f32 %v391_v11, 0.0  ;;  %v876_v19 = vmul.f32 0.03125, %v326_v13  ;;  %v376_v23 = vmul.f32 0.03125, %v366_v18 }
 0x188   : > { %652 = vrsqrt.f32 %v414_v12  ;;  %v409_v10 = vsub.f32 %v818_v17, %v874_v14 }
 0x189   : > { %v415_v26 = vadd.f32 1e-05, %v399_v15  ;;  %v380_v29 = vmul.f32 %v876_v19, %v876_v19  ;;  %v392_v30 = vsub.f32 %v376_v23, %v384_v21  ;;  %v404_v6 = vsub.f32 %v841_v35, %v876_v19 }
 0x18a   : > { %v368_v31 = vpop.xlane.xlu0 %367  ;;  %v370_v36 = vpop.xlane.xlu1 %369 }
 0x18b   : > { %654 = vrsqrt.f32 %v415_v26  ;;  %v388_v34 = vsub.f32 %v372_v25, %v380_v29  ;;  %v377_v37 = vmul.f32 0.03125, %v368_v31  ;;  %v400_v39 = vmax.f32 %v392_v30, 0.0 }
 0x18c   : > { %v378_v40 = vmul.f32 0.03125, %v370_v36 }
 0x18d   : > { %v396_v41 = vmax.f32 %v388_v34, 0.0  ;;  %v393_v42 = vsub.f32 %v377_v37, %v385_v32  ;;  %v416_v43 = vadd.f32 1e-05, %v400_v39 }
 0x18e   : > { %v394_v44 = vsub.f32 %v378_v40, %v386_v38 }
 0x18f   : > { %v412_v46 = vadd.f32 1e-05, %v396_v41  ;;  %v401_v48 = vmax.f32 %v393_v42, 0.0  ;;  %656 = vrsqrt.f32 %v416_v43 }
 0x190   : > { %v649_v49 = vpop.eup %648  ;;  %v402_v52 = vmax.f32 %v394_v44, 0.0 }
 0x191   : > { %v429_v53 = vmul.f32 %v649_v49, %v405_v45  ;;  %658 = vrsqrt.f32 %v412_v46  ;;  %v417_v55 = vadd.f32 1e-05, %v401_v48 }
 0x192   : > { %v418_v57 = vadd.f32 1e-05, %v402_v52 }
 0x193   : > { %v441_v47 = vmul.f32 %v563_v50, %v429_v53  ;;  %660 = vrsqrt.f32 %v417_v55 }
 0x194   : > { %v651_v59 = vpop.eup %650  ;;  %662 = vrsqrt.f32 %v418_v57 }
 0x195   : > { %v653_v61 = vpop.eup %652  ;;  %v453_v62 = vadd.f32 %v564_v56, %v441_v47  ;;  %v427_v63 = vmul.f32 %v651_v59, %v403_v16 }
 0x196   : > { %v430_v0 = vmul.f32 %v653_v61, %v406_v60 }
 0x197   : > { %461 = vst [vmem:[%s905_s27 + $0x10] sm:$0xff] %v453_v62  ;;  %v439_v22 = vmul.f32 %v563_v50, %v427_v63 }
 0x198   : > { %v655_v51 = vpop.eup %654  ;;  %v442_v2 = vmul.f32 %v563_v50, %v430_v0 }
 0x199   : > { %v451_v3 = vadd.f32 %v564_v56, %v439_v22  ;;  %v431_v24 = vmul.f32 %v655_v51, %v407_v1 }
 0x19a   : > { %v454_v54 = vadd.f32 %v564_v56, %v442_v2 }
 0x19b   : > { %459 = vst [vmem:[%s905_s27] sm:$0xff] %v451_v3  ;;  %v443_v4 = vmul.f32 %v563_v50, %v431_v24 }
 0x19c   : > { %462 = vst [vmem:[%s905_s27 + $0x18] sm:$0xff] %v454_v54  ;;  %v657_v27 = vpop.eup %656 }
 0x19d   : > { %v455_v58 = vadd.f32 %v564_v56, %v443_v4  ;;  %v432_v9 = vmul.f32 %v657_v27, %v408_v5 }
 0x19e   : > { %v659_v7 = vpop.eup %658 }
 0x19f   : > { %463 = vst [vmem:[%s905_s27 + $0x20] sm:$0xff] %v455_v58  ;;  %v428_v11 = vmul.f32 %v659_v7, %v404_v6  ;;  %v444_v8 = vmul.f32 %v563_v50, %v432_v9 }
 0x1a0   : > { %v661_v12 = vpop.eup %660 }
 0x1a1   : > { %v663_v13 = vpop.eup %662  ;;  %v440_v15 = vmul.f32 %v563_v50, %v428_v11  ;;  %v433_v18 = vmul.f32 %v661_v12, %v409_v10  ;;  %v456_v35 = vadd.f32 %v564_v56, %v444_v8 }
 0x1a2   : > { %v434_v19 = vmul.f32 %v663_v13, %v410_v33 }
 0x1a3   : > { %v452_v17 = vadd.f32 %v564_v56, %v440_v15  ;;  %v445_v14 = vmul.f32 %v563_v50, %v433_v18  ;;  %464 = vst [vmem:[%s905_s27 + $0x28] sm:$0xff] %v456_v35 }
 0x1a4   : > { %v446_v21 = vmul.f32 %v563_v50, %v434_v19 }
 0x1a5   : > { %460 = vst [vmem:[%s905_s27 + $0x8] sm:$0xff] %v452_v17  ;;  %v457_v23 = vadd.f32 %v564_v56, %v445_v14 }
 0x1a6   : > { %v458_v28 = vadd.f32 %v564_v56, %v446_v21 }
 0x1a7   : > { %465 = vst [vmem:[%s905_s27 + $0x30] sm:$0xff] %v457_v23 }
 0x1a8   : > { %466 = vst [vmem:[%s905_s27 + $0x38] sm:$0xff] %v458_v28 }
 0x1a9   : > { %677 = shalt.err (!%p674_p3)
}
 0x1aa   : > { %s678_s10 = scalar_lea.hbm %s926_s5, 1024  ;;  %s682_s19 = scalar_lea.hbm %s977_s3, 2048 }
 0x1ab   : > { %p679_p4 = scmp.ne.s32.totalorder %s926_s5, %s678_s10  ;;  %p683_p9 = scmp.lt.s32.totalorder %s926_s5, %s977_s3 }
 0x1ac   : > { %p684_p10 = scmp.lt.s32.totalorder %s682_s19, %s678_s10 }
 0x1ad   : > { %p680_p7 = pnand %p679_p4, %p787_p5 }
 0x1ae   : > { %p685_p11 = por %p684_p10, %p683_p9 }
 0x1af   : > { %p681_p8 = pneg %p680_p7 }
 0x1b1   : > { %p686_p12 = pnand %p685_p11, %p681_p8 }
 0x1b3   : > { %689 = shalt.err (!%p686_p12)
}
 0x1b4   : > { %s727_s25 = smov 128   ;;  %s728_s26 = smov 8  }
 0x1b5   : > { %600 = dma.vmem_to_hbm [thread:$0]  (%p787_p5), %s928_s29, 1024, %s926_s5, %s934_s16, %s727_s25, %s727_s25, %s728_s26  }
 0x1b6 PF: > { %p606_p13 = scmp.ge.s32.totalorder %s724_s15, 2  ;;  %s496_s27 = sand.u32 1, %s712_s12  }
 0x1b7   : > { %s497_s28 = scalar_lea.sflag [#allocation3], %s496_s27 }
 0x1b8   : > { %p603_p0 = pnand %p606_p13, %p791_p6 }
 0x1ba   : > { %p604_p1 = pneg %p603_p0 }
 0x1bc   : > { %707 = dma.done.wait (%p604_p1), %s497_s28, 1024  }
 0x1bd   : > { %709 = vsyncadd (%p604_p1), %s497_s28, 4294966272  ;;  %p13_p2 = scmp.ge.s32.totalorder %s774_s18, 4   ;;  %s980_s12 = smov %s716_s13 }
 0x1be   : > { %s981_s13 = smov %s720_s14  ;;  %s982_s14 = smov %s785_s21 }
 0x1bf   : > { %s983_s15 = smov %s774_s18  ;;  %15 = sbr.rel (!%p13_p2) target bundleno = 3 (0x3), region = 67 }
 0x1c4   :  { %502 = vsyncpa [#allocation3], 1 }
 0x1c5   :  { %504 = vsyncpa [#allocation3 + $0x1], 1 }

</bundles_post_ra>
